<compile_context>
chip_gen: v7x
topology: tpu7x:2x2x1
jax: 0.10.0
libtpu: 0.0.40
codegen_flags: <defaults>
</compile_context>

<pallas_src>
import functools

import jax
import jax.numpy as jnp
from jax.experimental import pallas as pl
from jax.experimental.pallas import tpu as pltpu

_LANES = 128
_SUBLANES = 8
_MAX_ROW_TILE = 8192           # 8192 x 128 f32 = 4 MiB per input block per step
_VMEM_LIMIT_BYTES = 32 << 20   # 2 inputs x 2 buffers x 4 MiB + intermediates + headroom


def _num_tensorcores():
    """2 on v7x (dual TensorCore per chip), 1 on v5e/v6e/unknown (safe default)."""
    try:
        dev = jax.devices()[0]
        if dev.platform != "tpu":
            return 1
        kind = str(dev.device_kind).lower()
    except Exception:
        return 1
    return 2 if "v7" in kind else 1


def _l1_partial_sum_kernel(t_ref, p_ref, o_ref, *, row_tile, sub_rows,
                           steps_per_core, rows_valid):
    c = pl.program_id(0)   # row-range shard (one per TensorCore on v7x)
    i = pl.program_id(1)   # streaming step within the shard

    # Reset this shard's partial-sum block at the start of its row range.
    @pl.when(i == 0)
    def _():
        o_ref[...] = jnp.zeros_like(o_ref)

    # Logical (unclamped) block index -> global row offset of this block.
    blk = c * steps_per_core + i
    start_row = blk * row_tile
    n_sub = row_tile // sub_rows

    def chunk_delta(j, masked):
        lo = j * sub_rows          # static Python int -> static slice, zero runtime cost
        t = t_ref[lo:lo + sub_rows, :].astype(jnp.float32)
        p = p_ref[lo:lo + sub_rows, :].astype(jnp.float32)
        d = jnp.abs(t - p)
        if masked:
            # Keep this a SELECT (not a multiply): rows past the array edge in a ragged /
            # clamped-duplicate block hold undefined data (possibly NaN); where() kills them.
            row_ids = (start_row + lo
                       + jax.lax.broadcasted_iota(jnp.int32, (sub_rows, 1), 0))
            d = jnp.where(row_ids < rows_valid, d, 0.0)
        # Fold onto the vreg-shaped accumulator: sublane-group sum, no cross-lane work.
        return jnp.sum(d.reshape(sub_rows // _SUBLANES, _SUBLANES, _LANES), axis=0)

    needs_mask = start_row + row_tile > rows_valid

    # Fast path: interior blocks (all rows valid) skip the iota/compare/select entirely.
    @pl.when(jnp.logical_not(needs_mask))
    def _():
        for j in range(n_sub):     # RMW on o_ref per chunk bounds live intermediates
            o_ref[...] += chunk_delta(j, masked=False)

    # Slow path: ragged last block or clamped duplicate block -> per-row mask.
    @pl.when(needs_mask)
    def _():
        for j in range(n_sub):
            o_ref[...] += chunk_delta(j, masked=True)


def reconstruction_loss(target_sdf, predicted_sdf, *, max_row_tile=_MAX_ROW_TILE,
                        num_cores=None):
    """mean(|target_sdf - predicted_sdf|) over ALL elements (== torch L1Loss->mean)."""
    assert target_sdf.shape == predicted_sdf.shape
    n_true = 1
    for dim in target_sdf.shape:
        n_true *= dim
    if n_true == 0:
        # torch.mean of an empty tensor is NaN; avoid a divide-by-zero in the wrapper.
        return jnp.float32(jnp.nan)

    if num_cores is None:
        num_cores = _num_tensorcores()

    t_flat = jnp.ravel(target_sdf)
    p_flat = jnp.ravel(predicted_sdf)

    # Minimal padding to a lane-dense (rows, 128) slab with rows % 8 == 0.
    base = _SUBLANES * _LANES
    n_padded = pl.cdiv(n_true, base) * base
    if n_padded != n_true:
        t_flat = jnp.pad(t_flat, (0, n_padded - n_true))
        p_flat = jnp.pad(p_flat, (0, n_padded - n_true))

    rows = n_padded // _LANES
    t2 = t_flat.reshape(rows, _LANES)
    p2 = p_flat.reshape(rows, _LANES)

    row_tile = min(max_row_tile, rows)                 # multiple of 8 by construction
    # Sub-chunk size for the in-kernel block reduction: bounds the live |t-p| intermediate
    # to <= sub_rows x 128 f32 (<= 0.5 MiB) instead of the full 4 MiB block.
    if row_tile % 1024 == 0:
        sub_rows = 1024
    elif row_tile % 512 == 0:
        sub_rows = 512
    else:
        sub_rows = row_tile                            # small/odd tiles: single chunk

    steps = pl.cdiv(rows, row_tile)
    if steps < num_cores:
        num_cores = 1                                  # not enough blocks to split across TCs
    steps_per_core = pl.cdiv(steps, num_cores)

    kernel = functools.partial(
        _l1_partial_sum_kernel,
        row_tile=row_tile,
        sub_rows=sub_rows,
        steps_per_core=steps_per_core,
        rows_valid=rows,
    )

    def in_map(c, i):
        # Clamp so the DMA never targets a fully out-of-range block; the in-kernel row mask
        # zeroes any duplicated / ragged rows.
        return (jnp.minimum(c * steps_per_core + i, steps - 1), 0)

    partials = pl.pallas_call(
        kernel,
        out_shape=jax.ShapeDtypeStruct((num_cores, _SUBLANES, _LANES), jnp.float32),
        grid_spec=pltpu.PrefetchScalarGridSpec(
            num_scalar_prefetch=0,
            grid=(num_cores, steps_per_core),
            in_specs=[
                pl.BlockSpec((row_tile, _LANES), in_map),
                pl.BlockSpec((row_tile, _LANES), in_map),
            ],
            out_specs=pl.BlockSpec((None, _SUBLANES, _LANES), lambda c, i: (c, 0, 0)),
        ),
        compiler_params=pltpu.CompilerParams(
            dimension_semantics=("parallel", "arbitrary"),
            vmem_limit_bytes=_VMEM_LIMIT_BYTES,
        ),
    )(t2, p2)

    # Tiny final cross-lane reduction + mean normalization outside the kernel.
    return jnp.sum(partials) / jnp.float32(n_true)


if __name__ == "__main__":
    key = jax.random.PRNGKey(0)
    k1, k2, k3, k4, k5, k6, k7, k8 = jax.random.split(key, 8)

    # Main check: small SDF-like inputs (batch=2, 4x16x16 samples).
    shape = (2, 4, 16, 16)
    target_sdf = jax.random.normal(k1, shape, dtype=jnp.float32)
    predicted_sdf = jax.random.normal(k2, shape, dtype=jnp.float32)

    loss = reconstruction_loss(target_sdf, predicted_sdf)
    loss = jax.block_until_ready(loss)
    ref = jnp.mean(jnp.abs(target_sdf - predicted_sdf))
    assert jnp.allclose(loss, ref, rtol=1e-5, atol=1e-6), (loss, ref)

    # Check 2: ragged last block + forced 2-way shard (exercises the clamped-duplicate +
    # masked slow path even on single-TC devices).  rows=40, row_tile=16 -> steps=3.
    t2 = jax.random.normal(k3, (40, 128), dtype=jnp.float32)
    p2 = jax.random.normal(k4, (40, 128), dtype=jnp.float32)
    loss2 = jax.block_until_ready(
        reconstruction_loss(t2, p2, max_row_tile=16, num_cores=2))
    ref2 = jnp.mean(jnp.abs(t2 - p2))
    assert jnp.allclose(loss2, ref2, rtol=1e-5, atol=1e-6), (loss2, ref2)

    # Check 3: multi-step grid with multi-sub-chunk block reduction
    # (rows=4096, row_tile=2048, sub_rows=1024 -> 2 chunks/block, 2 steps).
    t3 = jax.random.normal(k5, (4096, 128), dtype=jnp.float32)
    p3 = jax.random.normal(k6, (4096, 128), dtype=jnp.float32)
    loss3 = jax.block_until_ready(reconstruction_loss(t3, p3, max_row_tile=2048))
    ref3 = jnp.mean(jnp.abs(t3 - p3))
    assert jnp.allclose(loss3, ref3, rtol=1e-5, atol=1e-6), (loss3, ref3)

    # Check 4: element count not a multiple of 8*128 (exercises the minimal zero-pad path).
    t4 = jax.random.normal(k7, (7, 33), dtype=jnp.float32)
    p4 = jax.random.normal(k8, (7, 33), dtype=jnp.float32)
    loss4 = jax.block_until_ready(reconstruction_loss(t4, p4))
    ref4 = jnp.mean(jnp.abs(t4 - p4))
    assert jnp.allclose(loss4, ref4, rtol=1e-5, atol=1e-6), (loss4, ref4)

    print("KERNEL_OK")
</pallas_src>

<mosaic_0001>
module attributes {stable_mosaic.version = 11 : i64} {
  func.func @_l1_partial_sum_kernel(%arg0: i32, %arg1: i32, %arg2: memref<16x128xf32, #tpu.memory_space<vmem>>, %arg3: memref<16x128xf32, #tpu.memory_space<vmem>>, %arg4: memref<1x8x128xf32, #tpu.memory_space<vmem>>) attributes {dimension_semantics = [#tpu.dimension_semantics<parallel>, #tpu.dimension_semantics<arbitrary>], iteration_bounds = array<i64: 1, 1>, scalar_prefetch = 0 : i64, scratch_operands = 0 : i64, tpu.core_type = #tpu.core_type<tc>, window_params = [{transform_indices = @transform_0, window_bounds = array<i64: 16, 128>}, {transform_indices = @transform_1, window_bounds = array<i64: 16, 128>}, {transform_indices = @transform_2, window_bounds = array<i64: 1, 8, 128>}]} {
    %c0_i32 = arith.constant 0 : i32
    %0 = arith.cmpi eq, %arg1, %c0_i32 : i32
    %1 = arith.extui %0 : i1 to i32
    %c0_i32_0 = arith.constant 0 : i32
    %2 = arith.cmpi ne, %1, %c0_i32_0 : i32
    scf.if %2 {
      %cst = arith.constant 0.000000e+00 : f32
      %13 = vector.broadcast %cst : f32 to vector<8x128xf32>
      %c0 = arith.constant 0 : index
      %c0_5 = arith.constant 0 : index
      %c0_6 = arith.constant 0 : index
      %14 = vector.load %arg4[%c0, %c0_5, %c0_6] : memref<1x8x128xf32, #tpu.memory_space<vmem>>, vector<1x8x128xf32>
      %15 = vector.shape_cast %14 : vector<1x8x128xf32> to vector<8x128xf32>
      %16 = vector.shape_cast %13 : vector<8x128xf32> to vector<1x8x128xf32>
      tpu.vector_store %arg4[%c0, %c0_5, %c0_6], %16 {strides = array<i32>} : memref<1x8x128xf32, #tpu.memory_space<vmem>>, vector<1x8x128xf32>,
    } else {
    }
    %c1_i32 = arith.constant 1 : i32
    %3 = arith.muli %arg0, %c1_i32 : i32
    %4 = arith.addi %3, %arg1 : i32
    %c16_i32 = arith.constant 16 : i32
    %5 = arith.muli %4, %c16_i32 : i32
    %c16_i32_1 = arith.constant 16 : i32
    %6 = arith.addi %5, %c16_i32_1 : i32
    %c16_i32_2 = arith.constant 16 : i32
    %7 = arith.cmpi sgt, %6, %c16_i32_2 : i32
    %true = arith.constant true
    %8 = arith.xori %7, %true : i1
    %9 = arith.extui %8 : i1 to i32
    %c0_i32_3 = arith.constant 0 : i32
    %10 = arith.cmpi ne, %9, %c0_i32_3 : i32
    scf.if %10 {
      %c0 = arith.constant 0 : index
      %c0_5 = arith.constant 0 : index
      %c0_6 = arith.constant 0 : index
      %13 = vector.load %arg4[%c0, %c0_5, %c0_6] : memref<1x8x128xf32, #tpu.memory_space<vmem>>, vector<1x8x128xf32>
      %14 = vector.shape_cast %13 : vector<1x8x128xf32> to vector<8x128xf32>
      %c0_7 = arith.constant 0 : index
      %c0_8 = arith.constant 0 : index
      %15 = vector.load %arg2[%c0_7, %c0_8] : memref<16x128xf32, #tpu.memory_space<vmem>>, vector<16x128xf32>
      %c0_9 = arith.constant 0 : index
      %c0_10 = arith.constant 0 : index
      %16 = vector.load %arg3[%c0_9, %c0_10] : memref<16x128xf32, #tpu.memory_space<vmem>>, vector<16x128xf32>
      %17 = arith.subf %15, %16 : vector<16x128xf32>
      %18 = math.absf %17 : vector<16x128xf32>
      %19 = vector.shape_cast %18 : vector<16x128xf32> to vector<2x8x128xf32>
      %cst = arith.constant dense<0.000000e+00> : vector<8x128xf32>
      %20 = vector.multi_reduction <add>, %19, %cst [0] : vector<2x8x128xf32> to vector<8x128xf32>
      %21 = arith.addf %14, %20 : vector<8x128xf32>
      %c0_11 = arith.constant 0 : index
      %c0_12 = arith.constant 0 : index
      %c0_13 = arith.constant 0 : index
      %22 = vector.load %arg4[%c0_11, %c0_12, %c0_13] : memref<1x8x128xf32, #tpu.memory_space<vmem>>, vector<1x8x128xf32>
      %23 = vector.shape_cast %22 : vector<1x8x128xf32> to vector<8x128xf32>
      %24 = vector.shape_cast %21 : vector<8x128xf32> to vector<1x8x128xf32>
      tpu.vector_store %arg4[%c0_11, %c0_12, %c0_13], %24 {strides = array<i32>} : memref<1x8x128xf32, #tpu.memory_space<vmem>>, vector<1x8x128xf32>,
    } else {
    }
    %11 = arith.extui %7 : i1 to i32
    %c0_i32_4 = arith.constant 0 : i32
    %12 = arith.cmpi ne, %11, %c0_i32_4 : i32
    scf.if %12 {
      %c0 = arith.constant 0 : index
      %c0_5 = arith.constant 0 : index
      %c0_6 = arith.constant 0 : index
      %13 = vector.load %arg4[%c0, %c0_5, %c0_6] : memref<1x8x128xf32, #tpu.memory_space<vmem>>, vector<1x8x128xf32>
      %14 = vector.shape_cast %13 : vector<1x8x128xf32> to vector<8x128xf32>
      %c0_7 = arith.constant 0 : index
      %c0_8 = arith.constant 0 : index
      %15 = vector.load %arg2[%c0_7, %c0_8] : memref<16x128xf32, #tpu.memory_space<vmem>>, vector<16x128xf32>
      %c0_9 = arith.constant 0 : index
      %c0_10 = arith.constant 0 : index
      %16 = vector.load %arg3[%c0_9, %c0_10] : memref<16x128xf32, #tpu.memory_space<vmem>>, vector<16x128xf32>
      %17 = arith.subf %15, %16 : vector<16x128xf32>
      %18 = math.absf %17 : vector<16x128xf32>
      %c0_i32_11 = arith.constant 0 : i32
      %19 = arith.addi %5, %c0_i32_11 : i32
      %20 = tpu.iota {dimensions = array<i32: 0>} : vector<16x1xi32>
      %21 = vector.broadcast %19 : i32 to vector<16x1xi32>
      %22 = arith.addi %21, %20 : vector<16x1xi32>
      %c16_i32_12 = arith.constant 16 : i32
      %23 = vector.broadcast %c16_i32_12 : i32 to vector<16x1xi32>
      %24 = arith.cmpi slt, %22, %23 : vector<16x1xi32>
      %cst = arith.constant 0.000000e+00 : f32
      %25 = vector.shape_cast %24 : vector<16x1xi1> to vector<16x1xi1>
      %26 = vector.broadcast %25 : vector<16x1xi1> to vector<16x128xi1>
      %27 = vector.broadcast %cst : f32 to vector<16x128xf32>
      %28 = arith.select %26, %18, %27 : vector<16x128xi1>, vector<16x128xf32>
      %29 = vector.shape_cast %28 : vector<16x128xf32> to vector<2x8x128xf32>
      %cst_13 = arith.constant dense<0.000000e+00> : vector<8x128xf32>
      %30 = vector.multi_reduction <add>, %29, %cst_13 [0] : vector<2x8x128xf32> to vector<8x128xf32>
      %31 = arith.addf %14, %30 : vector<8x128xf32>
      %c0_14 = arith.constant 0 : index
      %c0_15 = arith.constant 0 : index
      %c0_16 = arith.constant 0 : index
      %32 = vector.load %arg4[%c0_14, %c0_15, %c0_16] : memref<1x8x128xf32, #tpu.memory_space<vmem>>, vector<1x8x128xf32>
      %33 = vector.shape_cast %32 : vector<1x8x128xf32> to vector<8x128xf32>
      %34 = vector.shape_cast %31 : vector<8x128xf32> to vector<1x8x128xf32>
      tpu.vector_store %arg4[%c0_14, %c0_15, %c0_16], %34 {strides = array<i32>} : memref<1x8x128xf32, #tpu.memory_space<vmem>>, vector<1x8x128xf32>,
    } else {
    }
    return
  }
  func.func @transform_0(%arg0: i32, %arg1: i32) -> (i32, i32) {
    %c1_i32 = arith.constant 1 : i32
    %0 = arith.muli %arg0, %c1_i32 : i32
    %1 = arith.addi %0, %arg1 : i32
    %c0_i32 = arith.constant 0 : i32
    %2 = arith.minsi %1, %c0_i32 : i32
    %c0_i32_0 = arith.constant 0 : i32
    %c0_i32_1 = arith.constant 0 : i32
    return %2, %c0_i32_0 : i32, i32
  }
  func.func @transform_1(%arg0: i32, %arg1: i32) -> (i32, i32) {
    %c1_i32 = arith.constant 1 : i32
    %0 = arith.muli %arg0, %c1_i32 : i32
    %1 = arith.addi %0, %arg1 : i32
    %c0_i32 = arith.constant 0 : i32
    %2 = arith.minsi %1, %c0_i32 : i32
    %c0_i32_0 = arith.constant 0 : i32
    %c0_i32_1 = arith.constant 0 : i32
    return %2, %c0_i32_0 : i32, i32
  }
  func.func @transform_2(%arg0: i32, %arg1: i32) -> (i32, i32, i32) {
    %c0_i32 = arith.constant 0 : i32
    %c0_i32_0 = arith.constant 0 : i32
    %c0_i32_1 = arith.constant 0 : i32
    return %arg0, %c0_i32, %c0_i32_0 : i32, i32, i32
  }
}

</mosaic_0001>

<bundles_post_ra>
// kernel: tpu_custom_call.1
= control target key start
LH: loop header
LB: loop body
LE: loop exit
PB: predicated region body
PF: predicated region fallthrough
CT: control target
= control target key end

     0   :  { %7 = vsyncpa [#allocation3], 0  ;;  %s268_s0 = inlined_call_operand.hbm [shape: f32[16,128], index: 0, kind: input, shape index: {}]   ;;  %s269_s1 = inlined_call_operand.hbm [shape: f32[16,128], index: 1, kind: input, shape index: {}]   ;;  %s270_s2 = inlined_call_operand.hbm [shape: f32[1,8,128], index: 2, kind: output, shape index: {}]  }
   0x1   :  { %8 = vsyncpa [#allocation6], 0 }
   0x2   :  { %9 = vsyncpa [#allocation4], 0  ;;  %s212_s9 = smov [#allocation2]   ;;  %s140_s13 = scalar_lea.hbm %s268_s0, 256 }
   0x3   :  { %s21_s10 = sshll.u32 %s212_s9, 4  ;;  %p141_p0 = scmp.ne.s32.totalorder %s268_s0, %s140_s13  ;;  %s22_s10 = int_to_ptr.vmem [resolvable:$true] %s21_s10 }
   0x4   :  { %p144_p1 = scmp.lt.u32.totalorder %s140_s13, %s268_s0 }
   0x6   :  { %p146_p2 = pnand %p144_p1, %p141_p0 }
   0x8   :  { %149 = shalt.err (!%p146_p2)
}
   0x9   :  { %s150_s18 = scalar_lea.vmem %s22_s10, 256  ;;  %p155_p4 = scmp.lt.s32.totalorder %s22_s10, %s22_s10 }
   0xa   :  { %p151_p3 = scmp.ne.s32.totalorder %s22_s10, %s150_s18  ;;  %p156_p5 = scmp.lt.s32.totalorder %s150_s18, %s150_s18 }
   0xc   :  { %p157_p6 = por %p156_p5, %p155_p4 }
   0xe   :  { %p158_p7 = pnand %p157_p6, %p151_p3 }
  0x10   :  { %161 = shalt.err (!%p158_p7)
}
  0x11   :  { %s213_s19 = smov 128   ;;  %s214_s20 = smov 8  }
  0x12   :  { %27 = dma.hbm_to_vmem [thread:$0]  %s268_s0, 256, %s22_s10, [#allocation3], %s213_s19, %s213_s19, %s214_s20  }
  0x13   :  { %s215_s23 = smov [#allocation5]   ;;  %s162_s27 = scalar_lea.hbm %s269_s1, 256 }
  0x14   :  { %s39_s24 = sshll.u32 %s215_s23, 4  ;;  %p163_p8 = scmp.ne.s32.totalorder %s269_s1, %s162_s27  ;;  %s40_s24 = int_to_ptr.vmem [resolvable:$true] %s39_s24 }
  0x15   :  { %p166_p9 = scmp.lt.u32.totalorder %s162_s27, %s269_s1 }
  0x17   :  { %p168_p10 = pnand %p166_p9, %p163_p8 }
  0x19   :  { %171 = shalt.err (!%p168_p10)
}
  0x1a   :  { %s172_s4 = scalar_lea.vmem %s40_s24, 256  ;;  %p177_p12 = scmp.lt.s32.totalorder %s40_s24, %s40_s24 }
  0x1b   :  { %p173_p11 = scmp.ne.s32.totalorder %s40_s24, %s172_s4  ;;  %p178_p13 = scmp.lt.s32.totalorder %s172_s4, %s172_s4 }
  0x1d   :  { %p179_p0 = por %p178_p13, %p177_p12 }
  0x1f   :  { %p180_p1 = pnand %p179_p0, %p173_p11 }
  0x21   :  { %183 = shalt.err (!%p180_p1)
}
  0x22   :  { %45 = dma.hbm_to_vmem [thread:$0]  %s269_s1, 256, %s40_s24, [#allocation6], %s213_s19, %s213_s19, %s214_s20  }
  0x23   :  { %206 = dma.done.wait [#allocation3], 256  }
  0x24   :  { %207 = vsyncadd [#allocation3], 4294967040 }
  0x25   :  { %208 = dma.done.wait [#allocation6], 256  }
  0x26   :  { %209 = vsyncadd [#allocation6], 4294967040  ;;  %v74_v0 = vld [vmem:[#allocation2] sm:$0xff]  ;;  %v75_v1 = vld [vmem:[#allocation2 + $0x8] sm:$0xff]  ;;  %s216_s6 = smov [#allocation7]  }
  0x27   :  { %v76_v2 = vld [vmem:[#allocation5] sm:$0xff]  ;;  %v77_v3 = vld [vmem:[#allocation5 + $0x8] sm:$0xff]  ;;  %s120_s7 = sshll.u32 %s216_s6, 4  ;;  %s121_s7 = int_to_ptr.vmem [resolvable:$true] %s120_s7 }
  0x28   :  { %v78_v4 = vsub.f32 %v74_v0, %v76_v2  ;;  %v79_v5 = vsub.f32 %v75_v1, %v77_v3  ;;  %s184_s8 = scalar_lea.vmem %s121_s7, 128  ;;  %p189_p3 = scmp.lt.s32.totalorder %s121_s7, %s121_s7 }
  0x29   :  { %p185_p2 = scmp.ne.s32.totalorder %s121_s7, %s184_s8  ;;  %p190_p4 = scmp.lt.s32.totalorder %s184_s8, %s184_s8 }
  0x2a   :  { %v80_v6 = vand.u32 2147483647, %v78_v4  ;;  %v81_v7 = vand.u32 2147483647, %v79_v5 }
  0x2b   :  { %p191_p5 = por %p190_p4, %p189_p3 }
  0x2c   :  { %v82_v8 = vadd.f32 %v81_v7, %v80_v6 }
  0x2d   :  { %p192_p6 = pnand %p191_p5, %p185_p2 }
  0x2e   :  { %84 = vst [vmem:[#allocation7] sm:$0xff] %v82_v8 }
  0x2f   :  { %195 = shalt.err (!%p192_p6)
}
  0x30   :  { %s196_s10 = scalar_lea.hbm %s270_s2, 128 }
  0x31   :  { %p197_p7 = scmp.ne.s32.totalorder %s270_s2, %s196_s10  ;;  %p200_p8 = scmp.lt.u32.totalorder %s196_s10, %s270_s2 }
  0x33   :  { %p202_p9 = pnand %p200_p8, %p197_p7 }
  0x35   :  { %205 = shalt.err (!%p202_p9)
}
  0x36   :  { %123 = dma.vmem_to_hbm [thread:$0]  %s121_s7, 128, %s270_s2, [#allocation4]  }
  0x37   :  { %210 = dma.done.wait [#allocation4], 128  }
  0x38   :  { %211 = vsyncadd [#allocation4], 4294967168 }
  0x39   :  { %127 = vsyncpa [#allocation3], 1 }
  0x3a   :  { %128 = vsyncpa [#allocation6], 1 }
  0x3b   :  { %129 = vsyncpa [#allocation4], 1 }

</bundles_post_ra>
